<compile_context>
chip_gen: v6e
topology: v6e:2x2x1
jax: 0.10.0
libtpu: 0.0.40
codegen_flags: <defaults>
</compile_context>

<pallas_src>
import math

import jax
import jax.numpy as jnp
from jax.experimental import pallas as pl
from jax.experimental.pallas import tpu as pltpu


# ----------------------------------------------------------------------------
# Fused kernel: conv(3x1, zero-pad 1) + folded BN + ELU + maxpool(3x1, s=2)
# ----------------------------------------------------------------------------
def _conv_bn_elu_pool_kernel(x_ref, w_ref, b_ref, o_ref, pool_ref):
    """Per grid step:

    x_ref:    (n_blk, H+2, C)    bf16, H already zero-padded in the wrapper
    w_ref:    (3, C, Cp)         bf16, BN scale folded, out-channels padded to Cp
    b_ref:    (1, Cp)            f32, folded conv bias + BN shift
    o_ref:    (n_blk, H_out, Cp) f32
    pool_ref: (n_blk, H+2, Cp)   f32 VMEM scratch used by the pooling stage
    """
    n_blk, h_pad, c_in = x_ref.shape
    H = h_pad - 2
    _, H_out, Cp = o_ref.shape
    m = n_blk * H

    # Three accumulating MXU matmuls on shifted views of the padded block
    # (single expression -> in-place accumulation in the MXU result buffer on
    # v7x; no (M, 3C) im2col temporary is ever materialized).
    def tap(k):
        lhs = x_ref[:, k:k + H, :].reshape(m, c_in)            # bf16 (m, C)
        return jax.lax.dot_general(
            lhs, w_ref[k],
            dimension_numbers=(((1,), (0,)), ((), ())),
            preferred_element_type=jnp.float32)                # f32 (m, Cp)

    conv = tap(0) + tap(1) + tap(2) + b_ref[...]               # (m, Cp) f32

    # ELU(alpha=1).  Negative branch via the cancellation-free identity
    # expm1(x) = tanh(x/2) * (exp(x) + 1); tanh/exp run on the EUP slot.
    neg = jnp.minimum(conv, 0.0)
    elu_neg = jnp.tanh(0.5 * neg) * (jnp.exp(neg) + 1.0)
    act = jnp.where(conv > 0, conv, elu_neg)                   # (m, Cp) f32

    # MaxPool over H (kernel 3, stride 2, padding 1): stage the activations in
    # a scratch with one -inf guard row on each side, then take three stride-2
    # windows and two maxima -> one dense store.
    ninf = jnp.full((n_blk, 1, Cp), -jnp.inf, jnp.float32)
    pool_ref[:, 0:1, :] = ninf
    pool_ref[:, H + 1:H + 2, :] = ninf
    pool_ref[:, 1:H + 1, :] = act.reshape(n_blk, H, Cp)

    p0 = pool_ref[:, pl.ds(0, H_out, 2), :]   # rows 2*ho     (= act[2*ho - 1])
    p1 = pool_ref[:, pl.ds(1, H_out, 2), :]   # rows 2*ho + 1 (= act[2*ho])
    p2 = pool_ref[:, pl.ds(2, H_out, 2), :]   # rows 2*ho + 2 (= act[2*ho + 1])
    o_ref[...] = jnp.maximum(jnp.maximum(p0, p1), p2).astype(o_ref.dtype)


def _pick_row_block(n_rows, H, target_rows=512):
    """Largest divisor of n_rows whose block covers <= ~target_rows matmul rows.

    Bounds per-step VMEM (keeps the kernel portable to v7x's smaller VMEM)
    while keeping the MXU M dimension large and amortizing per-step overhead.
    """
    cap = max(1, target_rows // max(H, 1))
    for d in range(min(n_rows, cap), 0, -1):
        if n_rows % d == 0:
            return d
    return 1


# ----------------------------------------------------------------------------
# Wrapper: BN folding, channel padding, B-folding, pallas_call
# ----------------------------------------------------------------------------
def conv_layer_forward(x, params, eps=1e-5):
    """Mirror of ConvLayer.forward (BatchNorm in inference mode).

    x: (B, A, H, C) float32 with C == c_in.
    Returns (B, A, H_out, C) float32 with H_out = (H - 1) // 2 + 1.
    """
    w_conv, b_conv, gamma, beta, mean, var = params
    B, A, H, C = x.shape
    H_out = (H - 1) // 2 + 1
    Cp = ((C + 127) // 128) * 128          # lane-dense padded channel dim

    # Fold inference-mode BatchNorm into the conv weight/bias, pad the output
    # channel dim to Cp and cast the matmul operands to bf16 (f32 accumulate).
    scale = gamma / jnp.sqrt(var + eps)                                  # (C,)
    w_taps = jnp.transpose(w_conv[..., 0], (2, 1, 0)) * scale[None, None, :]
    w_taps = jnp.pad(w_taps, ((0, 0), (0, 0), (0, Cp - C))).astype(jnp.bfloat16)
    b_fold = (b_conv - mean) * scale + beta
    b_fold = jnp.pad(b_fold, (0, Cp - C)).reshape(1, Cp).astype(jnp.float32)

    # Fold B into the matmul M dimension; zero-pad H once in HBM; stream bf16.
    N = B * A
    x_rows = jnp.pad(x.reshape(N, H, C).astype(jnp.bfloat16),
                     ((0, 0), (1, 1), (0, 0)))                 # (N, H+2, C)

    n_blk = _pick_row_block(N, H)
    grid = (N // n_blk,)

    out = pl.pallas_call(
        _conv_bn_elu_pool_kernel,
        out_shape=jax.ShapeDtypeStruct((N, H_out, Cp), jnp.float32),
        grid_spec=pltpu.PrefetchScalarGridSpec(
            num_scalar_prefetch=0,
            grid=grid,
            in_specs=[
                pl.BlockSpec((n_blk, H + 2, C), lambda n: (n, 0, 0)),
                pl.BlockSpec((3, C, Cp), lambda n: (0, 0, 0)),
                pl.BlockSpec((1, Cp), lambda n: (0, 0)),
            ],
            out_specs=pl.BlockSpec((n_blk, H_out, Cp), lambda n: (n, 0, 0)),
            scratch_shapes=[pltpu.VMEM((n_blk, H + 2, Cp), jnp.float32)],
        ),
        compiler_params=pltpu.CompilerParams(
            dimension_semantics=("parallel",),
            vmem_limit_bytes=32 * 1024 * 1024),
    )(x_rows, w_taps, b_fold)

    # Drop the channel padding and restore the (B, A, H_out, C) layout.
    return out.reshape(B, A, H_out, Cp)[..., :C]


# ----------------------------------------------------------------------------
# Pure-JAX f32 reference (follows the PyTorch ops literally) for validation
# ----------------------------------------------------------------------------
def conv_layer_ref(x, params, eps=1e-5):
    w_conv, b_conv, gamma, beta, mean, var = params
    xp = jnp.transpose(x, (0, 3, 2, 1))                        # (B, C, H, A)
    B, C, H, A = xp.shape
    xpad = jnp.pad(xp, ((0, 0), (0, 0), (1, 1), (0, 0)))
    xsh = jnp.stack([xpad[:, :, kh:kh + H, :] for kh in range(3)], axis=2)
    conv = jnp.einsum('ock,bckha->boha', w_conv[..., 0], xsh)
    conv = conv + b_conv[None, :, None, None]
    scale = (gamma / jnp.sqrt(var + eps))[None, :, None, None]
    bn = (conv - mean[None, :, None, None]) * scale + beta[None, :, None, None]
    act = jnp.where(bn > 0, bn, jnp.expm1(jnp.minimum(bn, 0.0)))
    apad = jnp.pad(act, ((0, 0), (0, 0), (1, 1), (0, 0)),
                   constant_values=-jnp.inf)
    H_out = (H - 1) // 2 + 1
    pooled = jnp.stack(
        [jnp.max(apad[:, :, 2 * ho:2 * ho + 3, :], axis=2) for ho in range(H_out)],
        axis=2)                                                # (B, C, H_out, A)
    return jnp.transpose(pooled, (0, 3, 2, 1))                 # (B, A, H_out, C)


# ----------------------------------------------------------------------------
# Deterministic parameters + demo
# ----------------------------------------------------------------------------
def make_params(key, c_in):
    kw, kb, kg, kbe, km, kv = jax.random.split(key, 6)
    bound = 1.0 / math.sqrt(c_in * 3)
    w_conv = jax.random.uniform(kw, (c_in, c_in, 3, 1), jnp.float32, -bound, bound)
    b_conv = jax.random.uniform(kb, (c_in,), jnp.float32, -bound, bound)
    gamma = 1.0 + 0.1 * jax.random.normal(kg, (c_in,), jnp.float32)
    beta = 0.1 * jax.random.normal(kbe, (c_in,), jnp.float32)
    running_mean = 0.1 * jax.random.normal(km, (c_in,), jnp.float32)
    running_var = 1.0 + 0.2 * jax.random.uniform(kv, (c_in,), jnp.float32)
    return (w_conv, b_conv, gamma, beta, running_mean, running_var)


if __name__ == "__main__":
    B, A, H, C = 2, 4, 16, 32            # x: (B, A, H, C), c_in = C
    H_OUT = (H - 1) // 2 + 1

    key = jax.random.PRNGKey(0)
    key, kx = jax.random.split(key)
    x = jax.random.normal(kx, (B, A, H, C), jnp.float32)
    params = make_params(key, C)

    out = jax.jit(conv_layer_forward)(x, params)
    out = jax.block_until_ready(out)

    assert out.shape == (B, A, H_OUT, C)
    assert bool(jnp.all(jnp.isfinite(out)))

    ref = jax.block_until_ready(conv_layer_ref(x, params))
    # bf16 matmul operands (f32 accumulate) vs. the f32 reference: use a
    # bf16-appropriate tolerance.
    max_err = float(jnp.max(jnp.abs(out - ref)))
    assert bool(jnp.allclose(out, ref, atol=5e-2, rtol=5e-2)), max_err

    print("KERNEL_OK")
</pallas_src>

<mosaic_0001>
module attributes {stable_mosaic.version = 11 : i64} {
  func.func @_conv_bn_elu_pool_kernel(%arg0: i32, %arg1: memref<8x18x32xbf16, #tpu.memory_space<vmem>>, %arg2: memref<3x32x128xbf16, #tpu.memory_space<vmem>>, %arg3: memref<1x128xf32, #tpu.memory_space<vmem>>, %arg4: memref<8x8x128xf32, #tpu.memory_space<vmem>>, %arg5: memref<8x18x128xf32, #tpu.memory_space<vmem>>) attributes {dimension_semantics = [#tpu.dimension_semantics<parallel>], iteration_bounds = array<i64: 1>, scalar_prefetch = 0 : i64, scratch_operands = 1 : i64, tpu.core_type = #tpu.core_type<tc>, window_params = [{transform_indices = @transform_0, window_bounds = array<i64: 8, 18, 32>}, {pipeline_mode = #tpu.pipeline_mode<synchronous>, transform_indices = @transform_1, window_bounds = array<i64: 3, 32, 128>}, {pipeline_mode = #tpu.pipeline_mode<synchronous>, transform_indices = @transform_2, window_bounds = array<i64: 1, 128>}, {transform_indices = @transform_3, window_bounds = array<i64: 8, 8, 128>}]} {
    %c0 = arith.constant 0 : index
    %c0_0 = arith.constant 0 : index
    %c0_1 = arith.constant 0 : index
    %0 = vector.load %arg1[%c0, %c0_0, %c0_1] : memref<8x18x32xbf16, #tpu.memory_space<vmem>>, vector<8x16x32xbf16>
    %1 = vector.shape_cast %0 : vector<8x16x32xbf16> to vector<128x32xbf16>
    %c0_2 = arith.constant 0 : index
    %c0_3 = arith.constant 0 : index
    %c0_4 = arith.constant 0 : index
    %2 = vector.load %arg2[%c0_2, %c0_3, %c0_4] : memref<3x32x128xbf16, #tpu.memory_space<vmem>>, vector<1x32x128xbf16>
    %3 = vector.shape_cast %2 : vector<1x32x128xbf16> to vector<32x128xbf16>
    %cst = arith.constant dense<0.000000e+00> : vector<128x128xf32>
    %4 = tpu.matmul %1, %3, %cst {dimension_numbers = #tpu.dot_dimension_numbers<[1], [0], [0], [1], [0, 0, 1, 1], [], []>} : vector<128x32xbf16>, vector<32x128xbf16>, vector<128x128xf32> -> vector<128x128xf32>
    %c0_5 = arith.constant 0 : index
    %c1 = arith.constant 1 : index
    %c0_6 = arith.constant 0 : index
    %5 = vector.load %arg1[%c0_5, %c1, %c0_6] : memref<8x18x32xbf16, #tpu.memory_space<vmem>>, vector<8x16x32xbf16>
    %6 = vector.shape_cast %5 : vector<8x16x32xbf16> to vector<128x32xbf16>
    %c1_7 = arith.constant 1 : index
    %c0_8 = arith.constant 0 : index
    %c0_9 = arith.constant 0 : index
    %7 = vector.load %arg2[%c1_7, %c0_8, %c0_9] : memref<3x32x128xbf16, #tpu.memory_space<vmem>>, vector<1x32x128xbf16>
    %8 = vector.shape_cast %7 : vector<1x32x128xbf16> to vector<32x128xbf16>
    %cst_10 = arith.constant dense<0.000000e+00> : vector<128x128xf32>
    %9 = tpu.matmul %6, %8, %cst_10 {dimension_numbers = #tpu.dot_dimension_numbers<[1], [0], [0], [1], [0, 0, 1, 1], [], []>} : vector<128x32xbf16>, vector<32x128xbf16>, vector<128x128xf32> -> vector<128x128xf32>
    %10 = arith.addf %4, %9 : vector<128x128xf32>
    %c0_11 = arith.constant 0 : index
    %c2 = arith.constant 2 : index
    %c0_12 = arith.constant 0 : index
    %11 = vector.load %arg1[%c0_11, %c2, %c0_12] : memref<8x18x32xbf16, #tpu.memory_space<vmem>>, vector<8x16x32xbf16>
    %12 = vector.shape_cast %11 : vector<8x16x32xbf16> to vector<128x32xbf16>
    %c2_13 = arith.constant 2 : index
    %c0_14 = arith.constant 0 : index
    %c0_15 = arith.constant 0 : index
    %13 = vector.load %arg2[%c2_13, %c0_14, %c0_15] : memref<3x32x128xbf16, #tpu.memory_space<vmem>>, vector<1x32x128xbf16>
    %14 = vector.shape_cast %13 : vector<1x32x128xbf16> to vector<32x128xbf16>
    %cst_16 = arith.constant dense<0.000000e+00> : vector<128x128xf32>
    %15 = tpu.matmul %12, %14, %cst_16 {dimension_numbers = #tpu.dot_dimension_numbers<[1], [0], [0], [1], [0, 0, 1, 1], [], []>} : vector<128x32xbf16>, vector<32x128xbf16>, vector<128x128xf32> -> vector<128x128xf32>
    %16 = arith.addf %10, %15 : vector<128x128xf32>
    %c0_17 = arith.constant 0 : index
    %c0_18 = arith.constant 0 : index
    %17 = vector.load %arg3[%c0_17, %c0_18] : memref<1x128xf32, #tpu.memory_space<vmem>>, vector<1x128xf32>
    %18 = vector.broadcast %17 : vector<1x128xf32> to vector<128x128xf32>
    %19 = arith.addf %16, %18 : vector<128x128xf32>
    %cst_19 = arith.constant 0.000000e+00 : f32
    %20 = vector.broadcast %cst_19 : f32 to vector<128x128xf32>
    %21 = arith.minimumf %19, %20 : vector<128x128xf32>
    %cst_20 = arith.constant 5.000000e-01 : f32
    %22 = vector.broadcast %cst_20 : f32 to vector<128x128xf32>
    %23 = arith.mulf %22, %21 : vector<128x128xf32>
    %24 = math.tanh %23 : vector<128x128xf32>
    %25 = math.exp %21 : vector<128x128xf32>
    %cst_21 = arith.constant 1.000000e+00 : f32
    %26 = vector.broadcast %cst_21 : f32 to vector<128x128xf32>
    %27 = arith.addf %25, %26 : vector<128x128xf32>
    %28 = arith.mulf %24, %27 : vector<128x128xf32>
    %cst_22 = arith.constant 0.000000e+00 : f32
    %29 = vector.broadcast %cst_22 : f32 to vector<128x128xf32>
    %30 = arith.cmpf ogt, %19, %29 : vector<128x128xf32>
    %31 = arith.select %30, %19, %28 : vector<128x128xi1>, vector<128x128xf32>
    %cst_23 = arith.constant 0xFF800000 : f32
    %32 = vector.broadcast %cst_23 : f32 to vector<8x1x128xf32>
    %c0_24 = arith.constant 0 : index
    %c0_25 = arith.constant 0 : index
    %c0_26 = arith.constant 0 : index
    %33 = vector.load %arg5[%c0_24, %c0_25, %c0_26] : memref<8x18x128xf32, #tpu.memory_space<vmem>>, vector<8x1x128xf32>
    tpu.vector_store %arg5[%c0_24, %c0_25, %c0_26], %32 {strides = array<i32>} : memref<8x18x128xf32, #tpu.memory_space<vmem>>, vector<8x1x128xf32>,
    %c0_27 = arith.constant 0 : index
    %c17 = arith.constant 17 : index
    %c0_28 = arith.constant 0 : index
    %34 = vector.load %arg5[%c0_27, %c17, %c0_28] : memref<8x18x128xf32, #tpu.memory_space<vmem>>, vector<8x1x128xf32>
    tpu.vector_store %arg5[%c0_27, %c17, %c0_28], %32 {strides = array<i32>} : memref<8x18x128xf32, #tpu.memory_space<vmem>>, vector<8x1x128xf32>,
    %35 = vector.shape_cast %31 : vector<128x128xf32> to vector<8x16x128xf32>
    %c0_29 = arith.constant 0 : index
    %c1_30 = arith.constant 1 : index
    %c0_31 = arith.constant 0 : index
    %36 = vector.load %arg5[%c0_29, %c1_30, %c0_31] : memref<8x18x128xf32, #tpu.memory_space<vmem>>, vector<8x16x128xf32>
    tpu.vector_store %arg5[%c0_29, %c1_30, %c0_31], %35 {strides = array<i32>} : memref<8x18x128xf32, #tpu.memory_space<vmem>>, vector<8x16x128xf32>,
    %c0_32 = arith.constant 0 : index
    %c0_33 = arith.constant 0 : index
    %c0_34 = arith.constant 0 : index
    %37 = tpu.strided_load %arg5[%c0_32, %c0_33, %c0_34] {strides = array<i32: 1, 2, 1>} : memref<8x18x128xf32, #tpu.memory_space<vmem>>, vector<8x8x128xf32>
    %c0_35 = arith.constant 0 : index
    %c1_36 = arith.constant 1 : index
    %c0_37 = arith.constant 0 : index
    %38 = tpu.strided_load %arg5[%c0_35, %c1_36, %c0_37] {strides = array<i32: 1, 2, 1>} : memref<8x18x128xf32, #tpu.memory_space<vmem>>, vector<8x8x128xf32>
    %c0_38 = arith.constant 0 : index
    %c2_39 = arith.constant 2 : index
    %c0_40 = arith.constant 0 : index
    %39 = tpu.strided_load %arg5[%c0_38, %c2_39, %c0_40] {strides = array<i32: 1, 2, 1>} : memref<8x18x128xf32, #tpu.memory_space<vmem>>, vector<8x8x128xf32>
    %40 = arith.maximumf %37, %38 : vector<8x8x128xf32>
    %41 = arith.maximumf %40, %39 : vector<8x8x128xf32>
    %c0_41 = arith.constant 0 : index
    %c0_42 = arith.constant 0 : index
    %c0_43 = arith.constant 0 : index
    %42 = vector.load %arg4[%c0_41, %c0_42, %c0_43] : memref<8x8x128xf32, #tpu.memory_space<vmem>>, vector<8x8x128xf32>
    tpu.vector_store %arg4[%c0_41, %c0_42, %c0_43], %41 {strides = array<i32>} : memref<8x8x128xf32, #tpu.memory_space<vmem>>, vector<8x8x128xf32>,
    return
  }
  func.func @transform_0(%arg0: i32) -> (i32, i32, i32) {
    %c0_i32 = arith.constant 0 : i32
    %c0_i32_0 = arith.constant 0 : i32
    %c0_i32_1 = arith.constant 0 : i32
    return %arg0, %c0_i32, %c0_i32_0 : i32, i32, i32
  }
  func.func @transform_1(%arg0: i32) -> (i32, i32, i32) {
    %c0_i32 = arith.constant 0 : i32
    %c0_i32_0 = arith.constant 0 : i32
    %c0_i32_1 = arith.constant 0 : i32
    %c0_i32_2 = arith.constant 0 : i32
    return %c0_i32, %c0_i32_0, %c0_i32_1 : i32, i32, i32
  }
  func.func @transform_2(%arg0: i32) -> (i32, i32) {
    %c0_i32 = arith.constant 0 : i32
    %c0_i32_0 = arith.constant 0 : i32
    %c0_i32_1 = arith.constant 0 : i32
    return %c0_i32, %c0_i32_0 : i32, i32
  }
  func.func @transform_3(%arg0: i32) -> (i32, i32, i32) {
    %c0_i32 = arith.constant 0 : i32
    %c0_i32_0 = arith.constant 0 : i32
    %c0_i32_1 = arith.constant 0 : i32
    return %arg0, %c0_i32, %c0_i32_0 : i32, i32, i32
  }
}

</mosaic_0001>

<bundles_post_ra>
// kernel: conv_layer_forward.1
= control target key start
LH: loop header
LB: loop body
LE: loop exit
PB: predicated region body
PF: predicated region fallthrough
CT: control target
= control target key end

     0   :  { %vm44_vm0 = vsmask.f32 3328  ;;  %vm45_vm1 = vsmask.f32 7440  ;;  %vm280_vm2 = vcmask 261120   ;;  %vm599_vm4 = vcmask 1042432   ;;  %s1902_s0 = inlined_call_operand.vmem [shape: bf16[8,18,32], index: 0, kind: input, shape index: {}]   ;;  %s1903_s1 = inlined_call_operand.vmem [shape: bf16[3,32,128], index: 1, kind: input, shape index: {}]   ;;  %s1904_s2 = inlined_call_operand.vmem [shape: f32[1,128], index: 2, kind: input, shape index: {}]   ;;  %s1905_s3 = inlined_call_operand.hbm [shape: f32[8,8,128], index: 3, kind: output, shape index: {}]  }
   0x1   :  { %v1291_v0 = vld [vmem:[%s1903_s1 + $0x18] sm:$0xff]   ;;  %v1292_v1 = vld [vmem:[%s1903_s1 + $0x10] sm:$0xff]   ;;  %v1424_v2 = vld [vmem:[%s1902_s0] sm:$0xf] }
   0x2   :  { %1283 = vmatprep.subr.bf16.mxu1 %v1291_v0  ;;  %1223 = vmatprep.subr.bf16.mxu0 %v1291_v0  ;;  %v1429_v3 = vld [vmem:[%s1902_s0 + $0x4] sm:$0xf]  ;;  %v1434_v4 = vld [vmem:[%s1902_s0 + $0x8] sm:$0x1]  ;;  %v48_v5 = vshrl.u32 %v1424_v2, 16  ;;  %v51_v6 = vshll.u32 %v1424_v2, 16  ;;  %vm1468_vm3 = vmor %vm44_vm0, %vm45_vm1 }
   0x3   :  { %1285 = vmatpush3.bf16.msra.mxu1 %v1291_v0  ;;  %1224 = vmatpush3.bf16.msra.mxu0 %v1291_v0  ;;  %v57_v7 = vshll.u32 %v1429_v3, 16  ;;  %v61_v8 = vshrl.u32 %v1429_v3, 16  ;;  %v67_v9 = vshll.u32 %v1434_v4, 16  ;;  %v1444_v10 = vld [vmem:[%s1902_s0 + $0x30] sm:$0xf]  ;;  %v607_v17 = vrot.slane %v1434_v4, 5 }
   0x4   :  { %1284 = vmatprep.subr.bf16.mxu1 %v1292_v1  ;;  %1225 = vmatprep.subr.bf16.mxu0 %v1292_v1  ;;  %v50_v11 = vrot.slane %v48_v5, 4  ;;  %v53_v12 = vrot.slane %v51_v6, 5  ;;  %v1449_v13 = vld [vmem:[%s1902_s0 + $0x34] sm:$0xf]  ;;  %v1454_v14 = vld [vmem:[%s1902_s0 + $0x38] sm:$0x1] }
   0x5   :  { %v59_v15 = vrot.slane %v57_v7, 5  ;;  %v63_v16 = vrot.slane %v61_v8, 4  ;;  %v144_v18 = vshrl.u32 %v1444_v10, 16  ;;  %v147_v20 = vshll.u32 %v1444_v10, 16  ;;  %v1464_v23 = vld [vmem:[%s1903_s1 + $0x8] sm:$0xff]  }
   0x6   :  { %v54_v19 = vor.u32 %v53_v12, %v50_v11  ;;  %v153_v21 = vshll.u32 %v1449_v13, 16  ;;  %v157_v22 = vshrl.u32 %v1449_v13, 16  ;;  %v69_v26 = vrot.slane %v67_v9, 5  ;;  %v1476_v29 = vld [vmem:[%s1902_s0 + $0xc] sm:$0xf] }
   0x7   :  { %1286 = vmatpush3.bf16.msra.mxu1 %v1292_v1  ;;  %1226 = vmatpush3.bf16.msra.mxu0 %v1292_v1  ;;  %v64_v25 = vor.u32 %v63_v16, %v59_v15  ;;  %v146_v27 = vrot.slane %v144_v18, 4  ;;  %v163_v28 = vshll.u32 %v1454_v14, 16  ;;  %v1481_v30 = vld [vmem:[%s1903_s1 + $0x28] sm:$0xff]   ;;  %v149_v32 = vrot.slane %v147_v20, 5  ;;  %v1487_v35 = vld [vmem:[%s1902_s0 + $0x10] sm:$0xf] }
   0x8   :  { %v55_v31 = vrot.slane %v54_v19, 4  ;;  %v155_v33 = vrot.slane %v153_v21, 5  ;;  %v159_v34 = vrot.slane %v157_v22, 4  ;;  %1243 = vmatprep.subr.bf16.mxu1 %v1464_v23  ;;  %v72_v38 = vshrl.u32 %v1476_v29, 16  ;;  %1263 = vmatprep.subr.bf16.mxu0 %v1481_v30  ;;  %v1497_v43 = vld [vmem:[%s1902_s0 + $0x14] sm:$0x1] }
   0x9   :  { %v65_v36 = vrot.slane %v64_v25, 4  ;;  %v165_v37 = vrot.slane %v163_v28, 5  ;;  %v75_v39 = vshll.u32 %v1476_v29, 16  ;;  %v150_v41 = vor.u32 %v149_v32, %v146_v27  ;;  %v1506_v49 = vld [vmem:[%s1902_s0 + $0x3c] sm:$0xf] }
   0xa   :  { %v60_v40 = vsel %vm1468_vm3, %v55_v31, %v59_v15  ;;  %v160_v42 = vor.u32 %v159_v34, %v155_v33  ;;  %v81_v44 = vshll.u32 %v1487_v35, 16  ;;  %v74_v46 = vrot.slane %v72_v38, 4  ;;  %v1512_v57 = vld [vmem:[%s1902_s0 + $0x40] sm:$0xf]  ;;  %v1523_v61 = vld [vmem:[%s1902_s0 + $0x44] sm:$0x1] }
   0xb   :  { %v70_v45 = vsel %vm1468_vm3, %v65_v36, %v69_v26  ;;  %v77_v47 = vrot.slane %v75_v39, 5  ;;  %v85_v48 = vshrl.u32 %v1487_v35, 16  ;;  %v151_v51 = vrot.slane %v150_v41, 4  ;;  %v1529_v63 = vld [vmem:[%s1902_s0 + $0x18] sm:$0xf] }
   0xc   :  { %v1126_v50 = vcombine.low %v60_v40, %v70_v45  ;;  %v161_v52 = vrot.slane %v160_v42, 4  ;;  %v83_v53 = vrot.slane %v81_v44, 5  ;;  %v91_v56 = vshll.u32 %v1497_v43, 16  ;;  %v1534_v7 = vld [vmem:[%s1902_s0 + $0x1c] sm:$0xf]  ;;  %v1296_v40 = vld [vmem:[%s1903_s1 + $0x20] sm:$0xff]  }
   0xd   :  { %v78_v54 = vor.u32 %v77_v47, %v74_v46  ;;  %v87_v55 = vrot.slane %v85_v48, 4  ;;  %v156_v58 = vsel %vm1468_vm3, %v151_v51, %v155_v33  ;;  %v611_v60 = vrot.slane %v1487_v35, 5  ;;  %v1542_v15 = vld [vmem:[%s1902_s0 + $0x20] sm:$0x1]  ;;  %v1552_v21 = vld [vmem:[%s1902_s0 + $0x48] sm:$0xf] }
   0xe   :  { %1227 = vmatprep.mubr.msk.bf16.mxu0 %vm280_vm2, %v1126_v50  ;;  %v166_v59 = vsel %vm1468_vm3, %v161_v52, %v165_v37  ;;  %v168_v62 = vshrl.u32 %v1506_v49, 16  ;;  %v93_v6 = vrot.slane %v91_v56, 5  ;;  %v171_v9 = vshll.u32 %v1506_v49, 16  ;;  %v1561_v39 = vld [vmem:[%s1902_s0 + $0x4c] sm:$0xf] }
   0xf   :  { %v1130_v0 = vcombine.low %v156_v58, %v166_v59  ;;  %v79_v1 = vrot.slane %v78_v54, 4  ;;  %v88_v5 = vor.u32 %v87_v55, %v83_v53  ;;  %v177_v11 = vshll.u32 %v1512_v57, 16  ;;  %v1573_v50 = vld [vmem:[%s1902_s0 + $0x50] sm:$0x1]  ;;  %v1581_v56 = vld [vmem:[%s1902_s0 + $0x24] sm:$0xf] }
  0x10   :  { %v170_v8 = vrot.slane %v168_v62, 4  ;;  %v181_v12 = vshrl.u32 %v1512_v57, 16  ;;  %v187_v19 = vshll.u32 %v1523_v61, 16  ;;  %v96_v20 = vshrl.u32 %v1529_v63, 16 }
  0x11   :  { %1235 = vmatprep.mubr.msk.bf16.mxu1 %vm280_vm2, %v1130_v0  ;;  %v84_v16 = vsel %vm1468_vm3, %v79_v1, %v83_v53  ;;  %v89_v18 = vrot.slane %v88_v5, 4  ;;  %v173_v22 = vrot.slane %v171_v9, 5  ;;  %v179_v25 = vrot.slane %v177_v11, 5  ;;  %v1295_v9 = vld [vmem:[%s1903_s1] sm:$0xff]  }
  0x12   :  { %v183_v26 = vrot.slane %v181_v12, 4  ;;  %v99_v27 = vshll.u32 %v1529_v63, 16  ;;  %v189_v31 = vrot.slane %v187_v19, 5  ;;  %v98_v32 = vrot.slane %v96_v20, 4 }
  0x13   :  { %v94_v28 = vsel %vm1468_vm3, %v89_v18, %v93_v6  ;;  %v105_v33 = vshll.u32 %v1534_v7, 16  ;;  %v174_v36 = vor.u32 %v173_v22, %v170_v8  ;;  %v109_v42 = vshrl.u32 %v1534_v7, 16  ;;  %v1604_v22 = vld [vmem:[%s1902_s0 + $0x2c] sm:$0x1] }
  0x14   :  { %v1127_v34 = vcombine.low %v84_v16, %v94_v28  ;;  %v184_v37 = vor.u32 %v183_v26, %v179_v25  ;;  %v101_v38 = vrot.slane %v99_v27, 5  ;;  %v115_v44 = vshll.u32 %v1542_v15, 16 }
  0x15   :  { %v107_v41 = vrot.slane %v105_v33, 5  ;;  %v192_v45 = vshrl.u32 %v1552_v21, 16  ;;  %v175_v46 = vrot.slane %v174_v36, 4  ;;  %v195_v51 = vshll.u32 %v1552_v21, 16  ;;  %v1613_v33 = vld [vmem:[%s1902_s0 + $0x54] sm:$0xf] }
  0x16   :  { %1228 = vmatmul.mubr.msk.bf16.vlgmr.msra.gmra.mxu0 %vm280_vm2, %v1127_v34  ;;  %v185_v47 = vrot.slane %v184_v37, 4  ;;  %v102_v48 = vor.u32 %v101_v38, %v98_v32  ;;  %v111_v52 = vrot.slane %v109_v42, 4  ;;  %v117_v53 = vrot.slane %v115_v44, 5 }
  0x17   :  { %1264 = vmatpush3.bf16.msra.mxu0 %v1481_v30  ;;  %v194_v54 = vrot.slane %v192_v45, 4  ;;  %v201_v55 = vshll.u32 %v1561_v39, 16  ;;  %v180_v58 = vsel %vm1468_vm3, %v175_v46, %v179_v25  ;;  %v197_v0 = vrot.slane %v195_v51, 5  ;;  %v1590_v30 = vld [vmem:[%s1902_s0 + $0x28] sm:$0xf] }
  0x18   :  { %v190_v59 = vsel %vm1468_vm3, %v185_v47, %v189_v31  ;;  %v103_v62 = vrot.slane %v102_v48, 4  ;;  %1265 = vmatprep.subr.bf16.mxu0 %v1296_v40  ;;  %v112_v5 = vor.u32 %v111_v52, %v107_v41  ;;  %v205_v8 = vshrl.u32 %v1561_v39, 16 }
  0x19   :  { %v1131_v1 = vcombine.low %v180_v58, %v190_v59  ;;  %v203_v6 = vrot.slane %v201_v55, 5  ;;  %v198_v12 = vor.u32 %v197_v0, %v194_v54  ;;  %v211_v16 = vshll.u32 %v1573_v50, 16 }
  0x1a   :  { %v108_v11 = vsel %vm1468_vm3, %v103_v62, %v107_v41  ;;  %v120_v18 = vshrl.u32 %v1581_v56, 16  ;;  %v113_v19 = vrot.slane %v112_v5, 4  ;;  %v207_v20 = vrot.slane %v205_v8, 4 }
  0x1b   :  { %1236 = vmatmul.mubr.msk.bf16.vlgmr.msra.gmra.mxu1 %vm280_vm2, %v1131_v1  ;;  %v123_v25 = vshll.u32 %v1581_v56, 16  ;;  %v129_v26 = vshll.u32 %v1590_v30, 16  ;;  %1266 = vmatpush3.bf16.msra.mxu0 %v1296_v40  ;;  %v199_v27 = vrot.slane %v198_v12, 4  ;;  %v213_v28 = vrot.slane %v211_v16, 5 }
  0x1c   :  { %1244 = vmatpush3.bf16.msra.mxu1 %v1464_v23  ;;  %v122_v31 = vrot.slane %v120_v18, 4  ;;  %v133_v32 = vshrl.u32 %v1590_v30, 16  ;;  %v118_v34 = vsel %vm1468_vm3, %v113_v19, %v117_v53  ;;  %v208_v36 = vor.u32 %v207_v20, %v203_v6  ;;  %v1620_v23 = vld [vmem:[%s1902_s0 + $0x58] sm:$0xf] }
  0x1d   :  { %1245 = vmatprep.subr.bf16.mxu1 %v1295_v9  ;;  %v125_v37 = vrot.slane %v123_v25, 5  ;;  %v131_v38 = vrot.slane %v129_v26, 5  ;;  %v1128_v40 = vcombine.low %v108_v11, %v118_v34  ;;  %v204_v41 = vsel %vm1468_vm3, %v199_v27, %v203_v6 }
  0x1e   :  { %v135_v42 = vrot.slane %v133_v32, 4  ;;  %v139_v44 = vshll.u32 %v1604_v22, 16 }
  0x1f   :  { %8 = vsyncpa [#allocation4], 0  ;;  %v209_v45 = vrot.slane %v208_v36, 4  ;;  %v126_v46 = vor.u32 %v125_v37, %v122_v31  ;;  %v216_v47 = vshrl.u32 %v1613_v33, 16  ;;  %v219_v48 = vshll.u32 %v1613_v33, 16  ;;  %1231 = vmatprep.mubr.msk.bf16.mxu0 %vm280_vm2, %v1128_v40 }
  0x20   :  { %v136_v51 = vor.u32 %v135_v42, %v131_v38  ;;  %v141_v52 = vrot.slane %v139_v44, 5  ;;  %v1631_v53 = vld [vmem:[%s1902_s0 + $0x5c] sm:$0x1]  ;;  %v225_v54 = vshll.u32 %v1620_v23, 16  ;;  %v229_v55 = vshrl.u32 %v1620_v23, 16  ;;  %1246 = vmatpush3.bf16.msra.mxu1 %v1295_v9 }
  0x21   :  { %v214_v58 = vsel %vm1468_vm3, %v209_v45, %v213_v28  ;;  %v127_v59 = vrot.slane %v126_v46, 4  ;;  %v218_v62 = vrot.slane %v216_v47, 4  ;;  %v221_v0 = vrot.slane %v219_v48, 5  ;;  %v575_v1 = vld [vmem:[%s1902_s0] sm:$0xe] }
  0x22   :  { %v1132_v5 = vcombine.low %v204_v41, %v214_v58  ;;  %v137_v6 = vrot.slane %v136_v51, 4  ;;  %v227_v8 = vrot.slane %v225_v54, 5  ;;  %v231_v11 = vrot.slane %v229_v55, 4  ;;  %v576_v18 = vld [vmem:[%s1902_s0 + $0xc] sm:$0xe] }
  0x23   :  { %v132_v12 = vsel %vm1468_vm3, %v127_v59, %v131_v38  ;;  %v222_v16 = vor.u32 %v221_v0, %v218_v62  ;;  %v235_v9 = vshll.u32 %v1631_v53, 16  ;;  %vm600_vm5 = vcmask 1046532   ;;  %v577_v28 = vld [vmem:[%s1902_s0 + $0x18] sm:$0xe]  ;;  %v578_v4 = vld [vmem:[%s1902_s0 + $0x24] sm:$0xe] }
  0x24   :  { %1239 = vmatprep.mubr.msk.bf16.mxu1 %vm280_vm2, %v1132_v5  ;;  %v142_v19 = vsel %vm1468_vm3, %v137_v6, %v141_v52  ;;  %v232_v20 = vor.u32 %v231_v11, %v227_v8  ;;  %vm1650_vm6 = vmor %vm599_vm4, %vm600_vm5  ;;  %v1162_v26 = vrot.slane %v575_v1, 9  ;;  %v604_v27 = vrot.slane %v1429_v3, 5 }
  0x25   :  { %v614_v31 = vrot.slane %v1497_v43, 5  ;;  %v1129_v32 = vcombine.low %v132_v12, %v142_v19  ;;  %v223_v34 = vrot.slane %v222_v16, 4  ;;  %v237_v36 = vrot.slane %v235_v9, 5 }
  0x26   :  { %v233_v37 = vrot.slane %v232_v20, 4  ;;  %v605_v38 = vsel %vm1650_vm6, %v1162_v26, %v604_v27  ;;  %v606_v40 = vrot.slane %v604_v27, 4  ;;  %v1163_v41 = vrot.slane %v576_v18, 9 }
  0x27   :  { %1232 = vmatmul.mubr.msk.bf16.gmra.mxu0 %vm280_vm2, %v1129_v32  ;;  %v228_v42 = vsel %vm1468_vm3, %v223_v34, %v227_v8  ;;  %v1144_v44 = vcombine.low %v1424_v2, %v1429_v3  ;;  %v613_v43 = vrot.slane %v611_v60, 4  ;;  %v1164_v45 = vrot.slane %v577_v28, 9 }
  0x28   :  { %v238_v46 = vsel %vm1468_vm3, %v233_v37, %v237_v36  ;;  %v608_v47 = vsel %vm1650_vm6, %v606_v40, %v607_v17  ;;  %v612_v48 = vsel %vm1650_vm6, %v1163_v41, %v611_v60  ;;  %v618_v51 = vrot.slane %v1534_v7, 5  ;;  %v579_v60 = vld [vmem:[%s1902_s0 + $0x30] sm:$0xe] }
  0x29   :  { %v1133_v2 = vcombine.low %v228_v42, %v238_v46  ;;  %v1174_v3 = vcombine.low %v605_v38, %v608_v47  ;;  %v615_v52 = vsel %vm1650_vm6, %v613_v43, %v614_v31  ;;  %v621_v24 = vrot.slane %v1542_v15, 5 }
  0x2a   :  { %v619_v17 = vsel %vm1650_vm6, %v1164_v45, %v618_v51  ;;  %v620_v54 = vrot.slane %v618_v51, 4  ;;  %v1175_v55 = vcombine.low %v612_v48, %v615_v52  ;;  %v625_v58 = vrot.slane %v1590_v30, 5 }
  0x2b   :  { %1240 = vmatmul.mubr.msk.bf16.gmra.mxu1 %vm280_vm2, %v1133_v2  ;;  %1267 = vmatprep.mubr.msk.bf16.mxu0 %vm280_vm2, %v1174_v3  ;;  %v1165_v59 = vrot.slane %v578_v4, 9  ;;  %v628_v62 = vrot.slane %v1604_v22, 5  ;;  %v632_v0 = vrot.slane %v1449_v13, 5  ;;  %v635_v1 = vrot.slane %v1454_v14, 5 }
  0x2c   :  { %1247 = vmatprep.mubr.msk.bf16.mxu1 %vm280_vm2, %v1144_v44  ;;  %v622_v15 = vsel %vm1650_vm6, %v620_v54, %v621_v24  ;;  %v627_v6 = vrot.slane %v625_v58, 4  ;;  %v1166_v8 = vrot.slane %v579_v60, 9  ;;  %v1145_v12 = vcombine.low %v1476_v29, %v1487_v35  ;;  %v580_v35 = vld [vmem:[%s1902_s0 + $0x3c] sm:$0xe] }
  0x2d   :  { %v1176_v5 = vcombine.low %v619_v17, %v622_v15  ;;  %v634_v11 = vrot.slane %v632_v0, 4  ;;  %v1146_v16 = vcombine.low %v1529_v63, %v1534_v7  ;;  %v626_v22 = vsel %vm1650_vm6, %v1165_v59, %v625_v58  ;;  %v581_v7 = vld [vmem:[%s1902_s0 + $0x48] sm:$0xe] }
  0x2e   :  { %v629_v14 = vsel %vm1650_vm6, %v627_v6, %v628_v62  ;;  %v639_v9 = vrot.slane %v1512_v57, 5  ;;  %v633_v18 = vsel %vm1650_vm6, %v1166_v8, %v632_v0  ;;  %v646_v63 = vrot.slane %v1561_v39, 5 }
  0x2f   :  { %1268 = vmatmul.mubr.msk.bf16.vlgmr.msra.gmra.mxu0 %vm280_vm2, %v1175_v55  ;;  %v636_v29 = vsel %vm1650_vm6, %v634_v11, %v635_v1  ;;  %v1177_v19 = vcombine.low %v626_v22, %v629_v14  ;;  %v1167_v26 = vrot.slane %v580_v35, 9  ;;  %v642_v28 = vrot.slane %v1523_v61, 5  ;;  %v1781_v1 = vld [vmem:[%s1904_s2] ss:$0 sm:$0xff]  ;;  %s1392_s2 = smov [#allocation3]  }
  0x30   :  { %1271 = vmatprep.mubr.msk.bf16.mxu0 %vm280_vm2, %v1176_v5  ;;  %v1178_v20 = vcombine.low %v633_v18, %v636_v29  ;;  %v641_v27 = vrot.slane %v639_v9, 4  ;;  %v1168_v31 = vrot.slane %v581_v7, 9  ;;  %v648_v32 = vrot.slane %v646_v63, 4  ;;  %s1111_s7 = sshll.u32 %s1392_s2, 4  ;;  %s1112_s7 = int_to_ptr.vmem [resolvable:$true] %s1111_s7 }
  0x31   :  { %v649_v34 = vrot.slane %v1573_v50, 5  ;;  %v1147_v36 = vcombine.low %v1581_v56, %v1590_v30  ;;  %v1148_v37 = vcombine.low %v1444_v10, %v1449_v13  ;;  %v640_v38 = vsel %vm1650_vm6, %v1167_v26, %v639_v9  ;;  %v582_v10 = vld [vmem:[%s1902_s0 + $0x54] sm:$0xe]  ;;  %s1369_s8 = scalar_lea.vmem %s1112_s7, 1024  ;;  %p1374_p1 = scmp.lt.s32.totalorder %s1112_s7, %s1112_s7 }
  0x32   :  { %v643_v61 = vsel %vm1650_vm6, %v641_v27, %v642_v28  ;;  %v653_v40 = vrot.slane %v1620_v23, 5  ;;  %v647_v50 = vsel %vm1650_vm6, %v1168_v31, %v646_v63  ;;  %v1169_v41 = vrot.slane %v582_v10, 9  ;;  %p1370_p0 = scmp.ne.s32.totalorder %s1112_s7, %s1369_s8  ;;  %p1375_p2 = scmp.lt.s32.totalorder %s1369_s8, %s1369_s8 }
  0x33   :  { %1248 = vmatmul.mubr.msk.bf16.vlgmr.msra.gmra.mxu1 %vm280_vm2, %v1145_v12  ;;  %v650_v56 = vsel %vm1650_vm6, %v648_v32, %v649_v34  ;;  %v1179_v13 = vcombine.low %v640_v38, %v643_v61  ;;  %v656_v44 = vrot.slane %v1631_v53, 5  ;;  %v1149_v43 = vcombine.low %v1506_v49, %v1512_v57 }
  0x34   :  { %1251 = vmatprep.mubr.msk.bf16.mxu1 %vm280_vm2, %v1146_v16  ;;  %v1180_v30 = vcombine.low %v647_v50, %v650_v56  ;;  %v655_v42 = vrot.slane %v653_v40, 4  ;;  %v1150_v45 = vcombine.low %v1552_v21, %v1561_v39  ;;  %v654_v46 = vsel %vm1650_vm6, %v1169_v41, %v653_v40  ;;  %p1376_p3 = por %p1375_p2, %p1374_p1 }
  0x35   :  { %v1151_v49 = vcombine.low %v1613_v33, %v1620_v23  ;;  %v1391_v57 = vmov -inf  }
  0x36   :  { %v657_v47 = vsel %vm1650_vm6, %v655_v42, %v656_v44  ;;  %1003 = vst [vmem:[#allocation2] sm:$0x1] %v1391_v57  ;;  %1004 = vst [vmem:[#allocation2 + $0x18] sm:$0x1] %v1391_v57  ;;  %p1377_p4 = pnand %p1376_p3, %p1370_p0 }
  0x37   :  { %1272 = vmatmul.mubr.msk.bf16.gmra.mxu0 %vm280_vm2, %v1177_v19  ;;  %v1181_v48 = vcombine.low %v654_v46, %v657_v47  ;;  %1005 = vst [vmem:[#allocation2 + $0x30] sm:$0x1] %v1391_v57  ;;  %1006 = vst [vmem:[#allocation2 + $0x48] sm:$0x1] %v1391_v57 }
  0x38   :  { %1275 = vmatprep.mubr.msk.bf16.mxu0 %vm280_vm2, %v1178_v20  ;;  %1007 = vst [vmem:[#allocation2 + $0x60] sm:$0x1] %v1391_v57  ;;  %1008 = vst [vmem:[#allocation2 + $0x78] sm:$0x1] %v1391_v57 }
  0x39   :  { %1009 = vst [vmem:[#allocation2 + $0x90] sm:$0x1] %v1391_v57  ;;  %1010 = vst [vmem:[#allocation2 + $0xa8] sm:$0x1] %v1391_v57 }
  0x3b   :  { %1252 = vmatmul.mubr.msk.bf16.gmra.mxu1 %vm280_vm2, %v1147_v36 }
  0x3c   :  { %1255 = vmatprep.mubr.msk.bf16.mxu1 %vm280_vm2, %v1148_v37 }
  0x3f   :  { %1276 = vmatmul.mubr.msk.bf16.gmra.mxu0 %vm280_vm2, %v1179_v13 }
  0x40   :  { %1279 = vmatprep.mubr.msk.bf16.mxu0 %vm280_vm2, %v1180_v30 }
  0x43   :  { %1256 = vmatmul.mubr.msk.bf16.gmra.mxu1 %vm280_vm2, %v1149_v43 }
  0x44   :  { %1259 = vmatprep.mubr.msk.bf16.mxu1 %vm280_vm2, %v1150_v45 }
  0x47   :  { %1280 = vmatmul.mubr.msk.bf16.gmra.mxu0 %vm280_vm2, %v1181_v48 }
  0x4b   :  { %1260 = vmatmul.mubr.msk.bf16.gmra.mxu1 %vm280_vm2, %v1151_v49 }
  0xd6   :  { %v1229_v21 = vpop.f32.mrf.mxu0 }
  0xd8   :  { %v339_v53 = vpop.f32.mrf.mxu0 }
  0xda   :  { %v1230_v33 = vpop.f32.mrf.mxu0 }
  0xdb   :  { %v1762_v39 = vpop.f32.mrf.mxu1 }
  0xdc   :  { %v342_v51 = vpop.f32.mrf.mxu0 }
  0xdd   :  { %v1764_v25 = vpop.f32.mrf.mxu1 }
  0xdf   :  { %v1766_v23 = vpop.f32.mrf.mxu1 }
  0xe1   :  { %v1768_v2 = vpop.f32.mrf.mxu1 }
  0xe7   :  { %v1233_v3 = vpop.f32.mrf.mxu0 }
  0xe9   :  { %v355_v52 = vpop.f32.mrf.mxu0 }
  0xeb   :  { %v1770_v24 = vpop.f32.mrf.mxu1  ;;  %v1234_v4 = vpop.f32.mrf.mxu0 }
  0xed   :  { %v1772_v17 = vpop.f32.mrf.mxu1  ;;  %v358_v54 = vpop.f32.mrf.mxu0 }
  0xef   :  { %v1774_v60 = vpop.f32.mrf.mxu1  ;;  %v1269_v55 = vpop.f32.mrf.mxu0 }
  0xf1   :  { %v1776_v58 = vpop.f32.mrf.mxu1  ;;  %v757_v15 = vpop.f32.mrf.mxu0 }
  0xf3   :  { %v1249_v59 = vpop.f32.mrf.mxu1  ;;  %v1270_v62 = vpop.f32.mrf.mxu0 }
  0xf4   :  { %v521_v0 = vadd.f32 %v1249_v59, %v1229_v21 }
  0xf5   :  { %v512_v5 = vpop.f32.mrf.mxu1  ;;  %v760_v6 = vpop.f32.mrf.mxu0 }
  0xf6   :  { %v822_v8 = vadd.f32 %v1269_v55, %v521_v0  ;;  %v513_v11 = vadd.f32 %v512_v5, %v339_v53 }
  0xf7   :  { %v1250_v12 = vpop.f32.mrf.mxu1  ;;  %v1273_v16 = vpop.f32.mrf.mxu0 }
  0xf8   :  { %v1784_v22 = vadd.f32 %v1781_v1, %v822_v8  ;;  %v820_v14 = vadd.f32 %v757_v15, %v513_v11  ;;  %v524_v9 = vadd.f32 %v1250_v12, %v1230_v33 }
  0xf9   :  { %v515_v18 = vpop.f32.mrf.mxu1  ;;  %v773_v29 = vpop.f32.mrf.mxu0 }
  0xfa   :  { %v861_v35 = vmin.f32 %v1784_v22, 0.0  ;;  %v1788_v63 = vadd.f32 %v1781_v1, %v820_v14  ;;  %v823_v7 = vadd.f32 %v1270_v62, %v524_v9  ;;  %v516_v19 = vadd.f32 %v515_v18, %v342_v51 }
  0xfb   :  { %v1253_v20 = vpop.f32.mrf.mxu1  ;;  %v1274_v26 = vpop.f32.mrf.mxu0  ;;  %vm973_vm7 = vcmp.gt.f32.partialorder %v1784_v22, 0.0 }
  0xfc   :  { %v877_v27 = vmul.f32 0.5, %v861_v35  ;;  %v911_v28 = vmul.f32 1.442695, %v861_v35  ;;  %v859_v31 = vmin.f32 %v1788_v63, 0.0  ;;  %v1792_v32 = vadd.f32 %v1781_v1, %v823_v7 }
  0xfd   :  { %v821_v34 = vadd.f32 %v760_v6, %v516_v19  ;;  %v537_v36 = vadd.f32 %v1253_v20, %v1233_v3  ;;  %v528_v37 = vpop.f32.mrf.mxu1  ;;  %v776_v38 = vpop.f32.mrf.mxu0  ;;  %vm971_vm8 = vcmp.gt.f32.partialorder %v1788_v63, 0.0 }
  0xfe   :  { %v907_v61 = vmul.f32 1.442695, %v859_v31  ;;  %v529_v40 = vadd.f32 %v528_v37, %v355_v52  ;;  %1305 = vpow2.f32 %v911_v28  ;;  %v875_v50 = vmul.f32 0.5, %v859_v31 }
  0xff   :  { %v862_v56 = vmin.f32 %v1792_v32, 0.0  ;;  %v1796_v10 = vadd.f32 %v1781_v1, %v821_v34  ;;  %v1254_v13 = vpop.f32.mrf.mxu1  ;;  %v1277_v30 = vpop.f32.mrf.mxu0  ;;  %1307 = vtanh.f32 %v877_v27  ;;  %v826_v41 = vadd.f32 %v1273_v16, %v537_v36 }
 0x100   :  { %v824_v42 = vadd.f32 %v773_v29, %v529_v40  ;;  %v540_v44 = vadd.f32 %v1254_v13, %v1234_v4  ;;  %1309 = vpow2.f32 %v907_v61  ;;  %vm974_vm9 = vcmp.gt.f32.partialorder %v1792_v32, 0.0 }
 0x101   :  { %v878_v43 = vmul.f32 0.5, %v862_v56  ;;  %v913_v45 = vmul.f32 1.442695, %v862_v56  ;;  %v860_v46 = vmin.f32 %v1796_v10, 0.0  ;;  %v531_v47 = vpop.f32.mrf.mxu1  ;;  %v1800_v48 = vadd.f32 %v1781_v1, %v826_v41  ;;  %v789_v3 = vpop.f32.mrf.mxu0 }
 0x102   :  { %v1803_v49 = vadd.f32 %v1781_v1, %v824_v42  ;;  %v827_v57 = vadd.f32 %v1274_v26, %v540_v44  ;;  %1311 = vtanh.f32 %v875_v50  ;;  %v532_v33 = vadd.f32 %v531_v47, %v358_v54 }
 0x103   :  { %v876_v21 = vmul.f32 0.5, %v860_v46  ;;  %v909_v53 = vmul.f32 1.442695, %v860_v46  ;;  %v1257_v51 = vpop.f32.mrf.mxu1  ;;  %1313 = vpow2.f32 %v913_v45  ;;  %v865_v52 = vmin.f32 %v1800_v48, 0.0  ;;  %v1278_v12 = vpop.f32.mrf.mxu0 }
 0x104   :  { %v863_v4 = vmin.f32 %v1803_v49, 0.0  ;;  %1315 = vtanh.f32 %v878_v43  ;;  %v1808_v55 = vadd.f32 %v1781_v1, %v827_v57  ;;  %v825_v15 = vadd.f32 %v776_v38, %v532_v33 }
 0x105   :  { %v544_v59 = vpop.f32.mrf.mxu1  ;;  %1317 = vpow2.f32 %v909_v53  ;;  %v881_v62 = vmul.f32 0.5, %v865_v52  ;;  %v919_v0 = vmul.f32 1.442695, %v865_v52  ;;  %v553_v16 = vadd.f32 %v1257_v51, %v1762_v39  ;;  %v792_v28 = vpop.f32.mrf.mxu0 }
 0x106   :  { %v879_v5 = vmul.f32 0.5, %v863_v4  ;;  %1319 = vtanh.f32 %v876_v21  ;;  %v915_v6 = vmul.f32 1.442695, %v863_v4  ;;  %v866_v54 = vmin.f32 %v1808_v55, 0.0 }
 0x107   :  { %v1812_v8 = vadd.f32 %v1781_v1, %v825_v15  ;;  %v1258_v11 = vpop.f32.mrf.mxu1  ;;  %1321 = vtanh.f32 %v881_v62  ;;  %v545_v14 = vadd.f32 %v544_v59, %v1764_v25  ;;  %v830_v19 = vadd.f32 %v1277_v30, %v553_v16  ;;  %v1281_v42 = vpop.f32.mrf.mxu0 }
 0x108   :  { %v556_v9 = vadd.f32 %v1258_v11, %v1766_v23  ;;  %1323 = vpow2.f32 %v919_v0  ;;  %v882_v18 = vmul.f32 0.5, %v866_v54  ;;  %v921_v29 = vmul.f32 1.442695, %v866_v54 }
 0x109   :  { %v864_v35 = vmin.f32 %v1812_v8, 0.0  ;;  %v547_v7 = vpop.f32.mrf.mxu1  ;;  %1325 = vtanh.f32 %v879_v5  ;;  %v828_v20 = vadd.f32 %v789_v3, %v545_v14  ;;  %v1820_v23 = vadd.f32 %v1781_v1, %v830_v19 }
 0x10a   :  { %1327 = vpow2.f32 %v915_v6  ;;  %v831_v27 = vadd.f32 %v1278_v12, %v556_v9  ;;  %v548_v56 = vadd.f32 %v547_v7, %v1768_v2  ;;  %vm972_vm10 = vcmp.gt.f32.partialorder %v1796_v10, 0.0 }
 0x10b   :  { %v917_v26 = vmul.f32 1.442695, %v864_v35  ;;  %v1261_v39 = vpop.f32.mrf.mxu1  ;;  %v1306_v31 = vpop.eup %1305  ;;  %1329 = vtanh.f32 %v882_v18  ;;  %v880_v25 = vmul.f32 0.5, %v864_v35  ;;  %v1823_v34 = vadd.f32 %v1781_v1, %v828_v20 }
 0x10c   :  { %v1308_v36 = vpop.eup %1307  ;;  %v941_v37 = vadd.f32 1.0, %v1306_v31  ;;  %1331 = vpow2.f32 %v921_v29  ;;  %v1827_v38 = vadd.f32 %v1781_v1, %v831_v27  ;;  %v869_v40 = vmin.f32 %v1820_v23, 0.0 }
 0x10d   :  { %v1310_v61 = vpop.eup %1309  ;;  %v867_v50 = vmin.f32 %v1823_v34, 0.0  ;;  %v569_v13 = vadd.f32 %v1261_v39, %v1770_v24  ;;  %1333 = vpow2.f32 %v917_v26  ;;  %v560_v44 = vpop.f32.mrf.mxu1  ;;  %v829_v3 = vadd.f32 %v792_v28, %v548_v56 }
 0x10e   :  { %v957_v30 = vmul.f32 %v1308_v36, %v941_v37  ;;  %v939_v41 = vadd.f32 1.0, %v1310_v61  ;;  %1335 = vtanh.f32 %v880_v25  ;;  %v885_v45 = vmul.f32 0.5, %v869_v40 }
 0x10f   :  { %v1312_v43 = vpop.eup %1311  ;;  %v927_v46 = vmul.f32 1.442695, %v869_v40  ;;  %v883_v47 = vmul.f32 0.5, %v867_v50  ;;  %v923_v53 = vmul.f32 1.442695, %v867_v50  ;;  %v870_v24 = vmin.f32 %v1827_v38, 0.0  ;;  %v1262_v62 = vpop.f32.mrf.mxu1 }
 0x110   :  { %v1314_v57 = vpop.eup %1313  ;;  %v989_v21 = vsel %vm973_vm7, %v1784_v22, %v957_v30  ;;  %v955_v2 = vmul.f32 %v1312_v43, %v939_v41  ;;  %1337 = vtanh.f32 %v885_v45  ;;  %v834_v52 = vadd.f32 %v1281_v42, %v569_v13  ;;  %v805_v22 = vpop.f32.mrf.mxu0 }
 0x111   :  { %v1316_v33 = vpop.eup %1315  ;;  %1021 = vst [vmem:[#allocation2 + $0x19] sm:$0xff] %v989_v21  ;;  %v942_v51 = vadd.f32 1.0, %v1314_v57  ;;  %1339 = vpow2.f32 %v927_v46  ;;  %v929_v59 = vmul.f32 1.442695, %v870_v24  ;;  %v1843_v54 = vadd.f32 %v1781_v1, %v829_v3 }
 0x112   :  { %v1318_v4 = vpop.eup %1317  ;;  %v987_v15 = vsel %vm971_vm8, %v1788_v63, %v955_v2  ;;  %1341 = vtanh.f32 %v883_v47  ;;  %v886_v12 = vmul.f32 0.5, %v870_v24  ;;  %v1846_v16 = vadd.f32 %v1781_v1, %v834_v52  ;;  %v1282_v26 = vpop.f32.mrf.mxu0 }
 0x113   :  { %v1320_v0 = vpop.eup %1319  ;;  %1019 = vst [vmem:[#allocation2 + $0x1] sm:$0xff] %v987_v15  ;;  %v958_v5 = vmul.f32 %v1316_v33, %v942_v51  ;;  %v940_v6 = vadd.f32 1.0, %v1318_v4  ;;  %1343 = vpow2.f32 %v923_v53  ;;  %v561_v63 = vadd.f32 %v560_v44, %v1772_v17  ;;  %v563_v17 = vpop.f32.mrf.mxu1 }
 0x114   :  { %v1322_v11 = vpop.eup %1321  ;;  %v868_v29 = vmin.f32 %v1843_v54, 0.0  ;;  %v572_v35 = vadd.f32 %v1262_v62, %v1774_v60  ;;  %vm977_vm11 = vcmp.gt.f32.partialorder %v1800_v48, 0.0  ;;  %1345 = vpow2.f32 %v929_v59  ;;  %v808_v41 = vpop.f32.mrf.mxu0 }
 0x115   :  { %v1324_v14 = vpop.eup %1323  ;;  %v990_v9 = vsel %vm974_vm9, %v1792_v32, %v958_v5  ;;  %v956_v18 = vmul.f32 %v1320_v0, %v940_v6  ;;  %v873_v20 = vmin.f32 %v1846_v16, 0.0  ;;  %vm975_vm12 = vcmp.gt.f32.partialorder %v1803_v49, 0.0 }
 0x116   :  { %v1326_v7 = vpop.eup %1325  ;;  %1022 = vst [vmem:[#allocation2 + $0x21] sm:$0xff] %v990_v9  ;;  %v945_v19 = vadd.f32 1.0, %v1324_v14  ;;  %v884_v28 = vmul.f32 0.5, %v868_v29  ;;  %v925_v39 = vmul.f32 1.442695, %v868_v29  ;;  %1347 = vtanh.f32 %v886_v12 }
 0x117   :  { %v1328_v27 = vpop.eup %1327  ;;  %v988_v32 = vsel %vm972_vm10, %v1796_v10, %v956_v18  ;;  %v935_v36 = vmul.f32 1.442695, %v873_v20  ;;  %v889_v61 = vmul.f32 0.5, %v873_v20  ;;  %v832_v40 = vadd.f32 %v805_v22, %v561_v63 }
 0x118   :  { %v1330_v60 = vpop.eup %1329  ;;  %1020 = vst [vmem:[#allocation2 + $0x9] sm:$0xff] %v988_v32  ;;  %v961_v31 = vmul.f32 %v1322_v11, %v945_v19  ;;  %v943_v25 = vadd.f32 1.0, %v1328_v27  ;;  %v835_v50 = vadd.f32 %v1282_v26, %v572_v35  ;;  %v564_v56 = vadd.f32 %v563_v17, %v1776_v58 }
 0x119   :  { %v1332_v37 = vpop.eup %1331  ;;  %1349 = vpow2.f32 %v925_v39  ;;  %v1865_v44 = vadd.f32 %v1781_v1, %v832_v40  ;;  %vm978_vm13 = vcmp.gt.f32.partialorder %v1808_v55, 0.0  ;;  %vm976_vm14 = vcmp.gt.f32.partialorder %v1812_v8, 0.0 }
 0x11a   :  { %v993_v10 = vsel %vm977_vm11, %v1800_v48, %v961_v31  ;;  %v959_v13 = vmul.f32 %v1326_v7, %v943_v25  ;;  %v946_v30 = vadd.f32 1.0, %v1332_v37  ;;  %v1334_v42 = vpop.eup %1333  ;;  %1351 = vtanh.f32 %v884_v28 }
 0x11b   :  { %1025 = vst [vmem:[#allocation2 + $0x49] sm:$0xff] %v993_v10  ;;  %v1868_v43 = vadd.f32 %v1781_v1, %v835_v50  ;;  %v833_v45 = vadd.f32 %v808_v41, %v564_v56  ;;  %v1336_v46 = vpop.eup %1335  ;;  %v944_v47 = vadd.f32 1.0, %v1334_v42  ;;  %1353 = vpow2.f32 %v935_v36 }
 0x11c   :  { %v991_v58 = vsel %vm975_vm12, %v1803_v49, %v959_v13  ;;  %v962_v48 = vmul.f32 %v1330_v60, %v946_v30  ;;  %v871_v57 = vmin.f32 %v1865_v44, 0.0  ;;  %1355 = vtanh.f32 %v889_v61 }
 0x11d   :  { %1023 = vst [vmem:[#allocation2 + $0x31] sm:$0xff] %v991_v58  ;;  %v874_v21 = vmin.f32 %v1868_v43, 0.0  ;;  %v1338_v2 = vpop.eup %1337  ;;  %v960_v24 = vmul.f32 %v1336_v46, %v944_v47  ;;  %v1878_v33 = vadd.f32 %v1781_v1, %v833_v45  ;;  %v1037_v51 = vld [vmem:[#allocation2 + $0x18] ss:$2 sm:$0xff]  ;;  %v1053_v49 = vld [vmem:[#allocation2 + $0x19] ss:$2 sm:$0xff] }
 0x11e   :  { %v994_v53 = vsel %vm978_vm13, %v1808_v55, %v962_v48  ;;  %v1340_v3 = vpop.eup %1339  ;;  %v887_v52 = vmul.f32 0.5, %v871_v57  ;;  %v931_v4 = vmul.f32 1.442695, %v871_v57  ;;  %v1083_v11 = vmax.f32 %v1037_v51, %v1053_v49  ;;  %v1069_v14 = vld [vmem:[#allocation2 + $0x1a] ss:$2 sm:$0xff] }
 0x11f   :  { %1026 = vst [vmem:[#allocation2 + $0x51] sm:$0xff] %v994_v53  ;;  %v1342_v15 = vpop.eup %1341  ;;  %v992_v59 = vsel %vm976_vm14, %v1812_v8, %v960_v24  ;;  %v949_v22 = vadd.f32 1.0, %v1340_v3  ;;  %v937_v62 = vmul.f32 1.442695, %v874_v21  ;;  %v872_v55 = vmin.f32 %v1878_v33, 0.0 }
 0x120   :  { %v1035_v0 = vld [vmem:[#allocation2] ss:$2 sm:$0xff]  ;;  %v1344_v5 = vpop.eup %1343  ;;  %1024 = vst [vmem:[#allocation2 + $0x39] sm:$0xff] %v992_v59  ;;  %1357 = vtanh.f32 %v887_v52  ;;  %v890_v1 = vmul.f32 0.5, %v874_v21  ;;  %v1051_v6 = vld [vmem:[#allocation2 + $0x1] ss:$2 sm:$0xff]  ;;  %v1091_v35 = vmax.f32 %v1083_v11, %v1069_v14 }
 0x121   :  { %v965_v12 = vmul.f32 %v1338_v2, %v949_v22  ;;  %vm981_vm15 = vcmp.gt.f32.partialorder %v1820_v23, 0.0  ;;  %v947_v63 = vadd.f32 1.0, %v1344_v5  ;;  %1359 = vpow2.f32 %v931_v4  ;;  %v1346_v9 = vpop.eup %1345  ;;  %v1067_v26 = vld [vmem:[#allocation2 + $0x2] ss:$2 sm:$0xff] }
 0x122   :  { %v888_v18 = vmul.f32 0.5, %v872_v55  ;;  %v933_v8 = vmul.f32 1.442695, %v872_v55  ;;  %v1082_v29 = vmax.f32 %v1035_v0, %v1051_v6  ;;  %v950_v20 = vadd.f32 1.0, %v1346_v9  ;;  %1099 = vst [vmem:[#allocation3 + $0x8] sm:$0xff] %v1091_v35 }
 0x123   :  { %v997_v7 = vsel %vm981_vm15, %v1820_v23, %v965_v12  ;;  %v963_v19 = vmul.f32 %v1342_v15, %v947_v63  ;;  %1361 = vpow2.f32 %v937_v62  ;;  %v1348_v17 = vpop.eup %1347  ;;  %vm979_vm0 = vcmp.gt.f32.partialorder %v1823_v34, 0.0 }
 0x124   :  { %1029 = vst [vmem:[#allocation2 + $0x79] sm:$0xff] %v997_v7  ;;  %1363 = vtanh.f32 %v890_v1  ;;  %v1090_v27 = vmax.f32 %v1082_v29, %v1067_v26  ;;  %v966_v28 = vmul.f32 %v1348_v17, %v950_v20  ;;  %vm982_vm1 = vcmp.gt.f32.partialorder %v1827_v38, 0.0 }
 0x125   :  { %v995_v32 = vsel %vm979_vm0, %v1823_v34, %v963_v19  ;;  %1365 = vpow2.f32 %v933_v8  ;;  %vm980_vm2 = vcmp.gt.f32.partialorder %v1843_v54, 0.0  ;;  %vm985_vm3 = vcmp.gt.f32.partialorder %v1846_v16, 0.0 }
 0x126   :  { %v1041_v39 = vld [vmem:[#allocation2 + $0x48] ss:$2 sm:$0xff]  ;;  %v1057_v60 = vld [vmem:[#allocation2 + $0x49] ss:$2 sm:$0xff]  ;;  %v1350_v31 = vpop.eup %1349  ;;  %1027 = vst [vmem:[#allocation2 + $0x61] sm:$0xff] %v995_v32  ;;  %1098 = vst [vmem:[#allocation3] sm:$0xff] %v1090_v27  ;;  %v998_v37 = vsel %vm982_vm1, %v1827_v38, %v966_v28  ;;  %1367 = vtanh.f32 %v888_v18 }
 0x127   :  { %v1073_v23 = vld [vmem:[#allocation2 + $0x4a] ss:$2 sm:$0xff]  ;;  %v1085_v25 = vmax.f32 %v1041_v39, %v1057_v60  ;;  %v1352_v36 = vpop.eup %1351  ;;  %v948_v61 = vadd.f32 1.0, %v1350_v31  ;;  %v1055_v50 = vld [vmem:[#allocation2 + $0x31] ss:$2 sm:$0xff]  ;;  %1030 = vst [vmem:[#allocation2 + $0x81] sm:$0xff] %v998_v37 }
 0x128   :  { %v1039_v40 = vld [vmem:[#allocation2 + $0x30] ss:$2 sm:$0xff]  ;;  %v1354_v56 = vpop.eup %1353  ;;  %vm983_vm4 = vcmp.gt.f32.partialorder %v1865_v44, 0.0  ;;  %vm986_vm5 = vcmp.gt.f32.partialorder %v1868_v43, 0.0  ;;  %vm984_vm6 = vcmp.gt.f32.partialorder %v1878_v33, 0.0 }
 0x129   :  { %v1084_v34 = vmax.f32 %v1039_v40, %v1055_v50  ;;  %v1093_v10 = vmax.f32 %v1085_v25, %v1073_v23  ;;  %v964_v13 = vmul.f32 %v1352_v36, %v948_v61  ;;  %v953_v30 = vadd.f32 1.0, %v1354_v56  ;;  %v1071_v41 = vld [vmem:[#allocation2 + $0x32] ss:$2 sm:$0xff]  ;;  %v1356_v42 = vpop.eup %1355 }
 0x12b   :  { %v1092_v45 = vmax.f32 %v1084_v34, %v1071_v41  ;;  %1101 = vst [vmem:[#allocation3 + $0x18] sm:$0xff] %v1093_v10  ;;  %v996_v46 = vsel %vm980_vm2, %v1843_v54, %v964_v13  ;;  %v969_v58 = vmul.f32 %v1356_v42, %v953_v30 }
 0x12c   :  { %1028 = vst [vmem:[#allocation2 + $0x69] sm:$0xff] %v996_v46 }
 0x12d   :  { %1100 = vst [vmem:[#allocation3 + $0x10] sm:$0xff] %v1092_v45  ;;  %v1358_v38 = vpop.eup %1357  ;;  %v1001_v48 = vsel %vm985_vm3, %v1846_v16, %v969_v58 }
 0x12e   :  { %v1360_v47 = vpop.eup %1359  ;;  %1033 = vst [vmem:[#allocation2 + $0xa9] sm:$0xff] %v1001_v48  ;;  %v1045_v21 = vld [vmem:[#allocation2 + $0x78] ss:$2 sm:$0xff]  ;;  %v1061_v2 = vld [vmem:[#allocation2 + $0x79] ss:$2 sm:$0xff] }
 0x12f   :  { %v951_v57 = vadd.f32 1.0, %v1360_v47  ;;  %v1087_v24 = vmax.f32 %v1045_v21, %v1061_v2  ;;  %v1077_v52 = vld [vmem:[#allocation2 + $0x7a] ss:$2 sm:$0xff] }
 0x130   :  { %v1362_v53 = vpop.eup %1361 }
 0x131   :  { %v1364_v51 = vpop.eup %1363  ;;  %v967_v49 = vmul.f32 %v1358_v38, %v951_v57  ;;  %v954_v3 = vadd.f32 1.0, %v1362_v53  ;;  %v1095_v4 = vmax.f32 %v1087_v24, %v1077_v52 }
 0x132   :  { %v1366_v54 = vpop.eup %1365 }
 0x133   :  { %v999_v15 = vsel %vm983_vm4, %v1865_v44, %v967_v49  ;;  %v970_v59 = vmul.f32 %v1364_v51, %v954_v3  ;;  %v952_v22 = vadd.f32 1.0, %v1366_v54  ;;  %v1043_v16 = vld [vmem:[#allocation2 + $0x60] ss:$2 sm:$0xff]  ;;  %v1059_v62 = vld [vmem:[#allocation2 + $0x61] ss:$2 sm:$0xff]  ;;  %v1368_v55 = vpop.eup %1367  ;;  %1103 = vst [vmem:[#allocation3 + $0x28] sm:$0xff] %v1095_v4 }
 0x134   :  { %1031 = vst [vmem:[#allocation2 + $0x91] sm:$0xff] %v999_v15  ;;  %v1086_v0 = vmax.f32 %v1043_v16, %v1059_v62  ;;  %v1075_v6 = vld [vmem:[#allocation2 + $0x62] ss:$2 sm:$0xff] }
 0x135   :  { %v1002_v5 = vsel %vm986_vm5, %v1868_v43, %v970_v59  ;;  %v968_v1 = vmul.f32 %v1368_v55, %v952_v22 }
 0x136   :  { %1034 = vst [vmem:[#allocation2 + $0xb1] sm:$0xff] %v1002_v5  ;;  %v1094_v11 = vmax.f32 %v1086_v0, %v1075_v6 }
 0x137   :  { %v1000_v44 = vsel %vm984_vm6, %v1878_v33, %v968_v1 }
 0x138   :  { %1032 = vst [vmem:[#allocation2 + $0x99] sm:$0xff] %v1000_v44  ;;  %1102 = vst [vmem:[#allocation3 + $0x20] sm:$0xff] %v1094_v11 }
 0x13d   :  { %v1049_v12 = vld [vmem:[#allocation2 + $0xa8] ss:$2 sm:$0xff]  ;;  %v1065_v63 = vld [vmem:[#allocation2 + $0xa9] ss:$2 sm:$0xff] }
 0x13e   :  { %v1089_v14 = vmax.f32 %v1049_v12, %v1065_v63  ;;  %v1081_v8 = vld [vmem:[#allocation2 + $0xaa] ss:$2 sm:$0xff] }
 0x13f   :  { %v1047_v9 = vld [vmem:[#allocation2 + $0x90] ss:$2 sm:$0xff]  ;;  %v1063_v18 = vld [vmem:[#allocation2 + $0x91] ss:$2 sm:$0xff] }
 0x140   :  { %v1088_v29 = vmax.f32 %v1047_v9, %v1063_v18  ;;  %v1097_v43 = vmax.f32 %v1089_v14, %v1081_v8  ;;  %v1079_v35 = vld [vmem:[#allocation2 + $0x92] ss:$2 sm:$0xff] }
 0x142   :  { %v1096_v7 = vmax.f32 %v1088_v29, %v1079_v35  ;;  %1105 = vst [vmem:[#allocation3 + $0x38] sm:$0xff] %v1097_v43 }
 0x144   :  { %1104 = vst [vmem:[#allocation3 + $0x30] sm:$0xff] %v1096_v7 }
 0x145   :  { %1380 = shalt.err (!%p1377_p4)
}
 0x146   :  { %s1393_s9 = smov 128   ;;  %s1394_s10 = smov 8  }
 0x147   :  { %1117 = dma.vmem_to_hbm [thread:$0]  %s1112_s7, 1024, %s1905_s3, [#allocation4], %s1393_s9, %s1393_s9, %s1394_s10  }
 0x148   :  { %1389 = dma.done.wait [#allocation4], 1024  }
 0x149   :  { %1390 = vsyncadd [#allocation4], 4294966272 }
 0x14a   :  { %1121 = vsyncpa [#allocation4], 1 }

</bundles_post_ra>
